<compile_context>
chip_gen: v7x
topology: tpu7x:2x2x1
jax: 0.10.0
libtpu: 0.0.40
codegen_flags: <defaults>
</compile_context>

<pallas_src>
import functools

import jax
import jax.numpy as jnp
from jax.experimental import pallas as pl
from jax.experimental.pallas import tpu as pltpu

VMEM_LIMIT = 32 * 1024 * 1024  # safe on v5e/v6e (128 MiB) and v7x (64 MiB)


# --------------------------- tiled linear kernels ----------------------------
def _matmul_kernel(x_ref, w_ref, o_ref):
    o_ref[...] = jnp.dot(
        x_ref[...], w_ref[...], preferred_element_type=jnp.float32
    ).astype(o_ref.dtype)


def _matmul_bias_kernel(x_ref, w_ref, b_ref, o_ref):
    acc = jnp.dot(x_ref[...], w_ref[...], preferred_element_type=jnp.float32)
    o_ref[...] = (acc + b_ref[...].astype(jnp.float32)).astype(o_ref.dtype)


def linear(x2, w, b=None, *, tm=128):
    """x2: [R, Din] @ w: [Din, Dout] (+ b: [Dout]). Row-tiled, W resident in VMEM."""
    R, Din = x2.shape
    Dout = w.shape[1]
    tm = min(tm, R)
    assert R % tm == 0, "rows must divide the row tile"

    in_specs = [
        pl.BlockSpec((tm, Din), lambda i: (i, 0)),
        pl.BlockSpec((Din, Dout), lambda i: (0, 0)),   # W resident across grid
    ]
    args = (x2, w)
    kernel = _matmul_kernel
    if b is not None:
        in_specs.append(pl.BlockSpec((1, Dout), lambda i: (0, 0)))
        args = (x2, w, b.reshape(1, Dout))
        kernel = _matmul_bias_kernel

    cost = pl.CostEstimate(
        flops=2 * R * Din * Dout,
        transcendentals=0,
        bytes_accessed=4 * (R * Din + Din * Dout + R * Dout),
    )
    return pl.pallas_call(
        kernel,
        out_shape=jax.ShapeDtypeStruct((R, Dout), x2.dtype),
        grid_spec=pltpu.PrefetchScalarGridSpec(
            num_scalar_prefetch=0,
            grid=(R // tm,),
            in_specs=in_specs,
            out_specs=pl.BlockSpec((tm, Dout), lambda i: (i, 0)),
        ),
        compiler_params=pltpu.CompilerParams(
            dimension_semantics=("parallel",),
            vmem_limit_bytes=VMEM_LIMIT,
        ),
        cost_estimate=cost,
    )(*args)


# ----------------------- fused flash-attention kernel ------------------------
def _flash_attn_kernel(q_ref, k_ref, v_ref, o_ref, m_sc, l_sc, acc_sc, *, scale):
    ki = pl.program_id(2)

    @pl.when(ki == 0)
    def _():
        m_sc[...] = jnp.full_like(m_sc, -jnp.inf)
        l_sc[...] = jnp.zeros_like(l_sc)
        acc_sc[...] = jnp.zeros_like(acc_sc)

    # Blocks carry all heads of one batch element: (heads, tile, dh).
    q = q_ref[...].astype(jnp.float32) * scale            # (h, tq, dh) - fold scale
    k = k_ref[...].astype(jnp.float32)                    # (h, tk, dh)
    s = jnp.einsum("hqd,hkd->hqk", q, k,
                   preferred_element_type=jnp.float32)    # (h, tq, tk)

    m_prev = m_sc[...]
    m_new = jnp.maximum(m_prev, s.max(axis=-1, keepdims=True))
    alpha = jnp.exp(m_prev - m_new)
    p = jnp.exp(s - m_new)
    l_sc[...] = alpha * l_sc[...] + p.sum(axis=-1, keepdims=True)
    acc_sc[...] = alpha * acc_sc[...] + jnp.einsum(
        "hqk,hkd->hqd", p.astype(v_ref.dtype), v_ref[...],
        preferred_element_type=jnp.float32)
    m_sc[...] = m_new

    @pl.when(ki == pl.num_programs(2) - 1)
    def _():
        o_ref[...] = (acc_sc[...] / l_sc[...]).astype(o_ref.dtype)


def flash_attention(q, k, v, *, scale, tq=128, tk=128):
    """q,k,v: [B, H, N, dh] -> softmax(q k^T * scale) v, fused online softmax.

    Grid = (B, q_tiles, kv_tiles); each step processes all H heads at once.
    """
    B, H, N, dh = q.shape
    tq = min(tq, N)
    tk = min(tk, N)
    assert N % tq == 0 and N % tk == 0, "seq len must divide the q/k tiles"

    kernel = functools.partial(_flash_attn_kernel, scale=scale)
    cost = pl.CostEstimate(
        flops=4 * B * H * N * N * dh,
        transcendentals=B * H * N * N,
        bytes_accessed=4 * (4 * B * H * N * dh),
    )
    return pl.pallas_call(
        kernel,
        out_shape=jax.ShapeDtypeStruct((B, H, N, dh), q.dtype),
        grid_spec=pltpu.PrefetchScalarGridSpec(
            num_scalar_prefetch=0,
            grid=(B, N // tq, N // tk),
            in_specs=[
                pl.BlockSpec((None, H, tq, dh), lambda b, qi, ki: (b, 0, qi, 0)),
                pl.BlockSpec((None, H, tk, dh), lambda b, qi, ki: (b, 0, ki, 0)),
                pl.BlockSpec((None, H, tk, dh), lambda b, qi, ki: (b, 0, ki, 0)),
            ],
            out_specs=pl.BlockSpec(
                (None, H, tq, dh), lambda b, qi, ki: (b, 0, qi, 0)),
            scratch_shapes=[
                pltpu.VMEM((H, tq, 1), jnp.float32),   # running max
                pltpu.VMEM((H, tq, 1), jnp.float32),   # running denom
                pltpu.VMEM((H, tq, dh), jnp.float32),  # output accumulator
            ],
        ),
        compiler_params=pltpu.CompilerParams(
            dimension_semantics=("parallel", "parallel", "arbitrary"),
            vmem_limit_bytes=VMEM_LIMIT,
        ),
        cost_estimate=cost,
    )(q, k, v)


# ------------------------------ Attention module -----------------------------
def attention(x, w_qkv, w_out, b_out, *, heads, dim_head):
    """x: [B, N, D]; w_qkv: [D, 3*heads*dim_head]; w_out: [heads*dim_head, D]."""
    B, N, D = x.shape
    inner = heads * dim_head
    scale = dim_head ** (-0.5)

    # to_qkv (bias=False), row-tiled Pallas matmul.
    qkv = linear(x.reshape(B * N, D), w_qkv)                 # (B*N, 3*inner)
    # Single transpose to (3, B, heads, N, dh), then slice q/k/v.
    qkv = qkv.reshape(B, N, 3, heads, dim_head).transpose(2, 0, 3, 1, 4)
    q, k, v = qkv[0], qkv[1], qkv[2]                         # (B, heads, N, dh)

    # Fused softmax(q k^T * scale) @ v, all heads per grid step.
    o = flash_attention(q, k, v, scale=scale)                # (B, heads, N, dh)
    o = o.transpose(0, 2, 1, 3).reshape(B * N, inner)

    # to_out projection (project_out=True since heads != 1).
    out = linear(o, w_out, b_out)                            # (B*N, D)
    return out.reshape(B, N, D)


if __name__ == "__main__":
    B, N, D = 2, 128, 128          # batch, tokens, dim
    heads, dim_head = 4, 64
    inner = heads * dim_head       # 256

    key = jax.random.PRNGKey(0)
    kx, kq, kw, kb = jax.random.split(key, 4)

    x = jax.random.normal(kx, (B, N, D), dtype=jnp.float32)
    w_qkv = jax.random.normal(kq, (D, 3 * inner), jnp.float32) / jnp.sqrt(D)
    w_out = jax.random.normal(kw, (inner, D), jnp.float32) / jnp.sqrt(inner)
    b_out = jax.random.normal(kb, (D,), jnp.float32) * 0.02

    out = attention(x, w_qkv, w_out, b_out, heads=heads, dim_head=dim_head)
    out = jax.block_until_ready(out)

    # ------------------------- pure-JAX reference -------------------------
    scale = dim_head ** (-0.5)
    qkv_r = x @ w_qkv
    q_r, k_r, v_r = jnp.split(qkv_r, 3, axis=-1)

    def heads_r(t):
        return t.reshape(B, N, heads, dim_head).transpose(0, 2, 1, 3)

    q_r, k_r, v_r = map(heads_r, (q_r, k_r, v_r))
    dots = jnp.einsum("bhnd,bhmd->bhnm", q_r, k_r) * scale
    attn = jax.nn.softmax(dots, axis=-1)
    o_r = jnp.einsum("bhnm,bhmd->bhnd", attn, v_r)
    o_r = o_r.transpose(0, 2, 1, 3).reshape(B, N, inner)
    ref = o_r @ w_out + b_out

    assert out.shape == (B, N, D)
    assert jnp.allclose(out, ref, atol=2e-3, rtol=2e-3), (
        "mismatch vs reference, max abs diff = %e" % float(jnp.max(jnp.abs(out - ref))))

    print("KERNEL_OK")
</pallas_src>

<mosaic_0001>
module attributes {stable_mosaic.version = 11 : i64} {
  func.func @_matmul_kernel(%arg0: i32, %arg1: memref<128x128xf32, #tpu.memory_space<vmem>>, %arg2: memref<128x768xf32, #tpu.memory_space<vmem>>, %arg3: memref<128x768xf32, #tpu.memory_space<vmem>>) attributes {dimension_semantics = [#tpu.dimension_semantics<parallel>], iteration_bounds = array<i64: 2>, scalar_prefetch = 0 : i64, scratch_operands = 0 : i64, tpu.core_type = #tpu.core_type<tc>, window_params = [{transform_indices = @transform_0, window_bounds = array<i64: 128, 128>}, {pipeline_mode = #tpu.pipeline_mode<synchronous>, transform_indices = @transform_1, window_bounds = array<i64: 128, 768>}, {transform_indices = @transform_2, window_bounds = array<i64: 128, 768>}]} {
    %c0 = arith.constant 0 : index
    %c0_0 = arith.constant 0 : index
    %0 = vector.load %arg1[%c0, %c0_0] : memref<128x128xf32, #tpu.memory_space<vmem>>, vector<128x128xf32>
    %c0_1 = arith.constant 0 : index
    %c0_2 = arith.constant 0 : index
    %1 = vector.load %arg2[%c0_1, %c0_2] : memref<128x768xf32, #tpu.memory_space<vmem>>, vector<128x768xf32>
    %cst = arith.constant dense<0.000000e+00> : vector<128x768xf32>
    %2 = tpu.matmul %0, %1, %cst {dimension_numbers = #tpu.dot_dimension_numbers<[1], [0], [0], [1], [0, 0, 1, 1], [], []>} : vector<128x128xf32>, vector<128x768xf32>, vector<128x768xf32> -> vector<128x768xf32>
    %c0_3 = arith.constant 0 : index
    %c0_4 = arith.constant 0 : index
    %3 = vector.load %arg3[%c0_3, %c0_4] : memref<128x768xf32, #tpu.memory_space<vmem>>, vector<128x768xf32>
    tpu.vector_store %arg3[%c0_3, %c0_4], %2 {strides = array<i32>} : memref<128x768xf32, #tpu.memory_space<vmem>>, vector<128x768xf32>,
    return
  }
  func.func @transform_0(%arg0: i32) -> (i32, i32) {
    %c0_i32 = arith.constant 0 : i32
    %c0_i32_0 = arith.constant 0 : i32
    return %arg0, %c0_i32 : i32, i32
  }
  func.func @transform_1(%arg0: i32) -> (i32, i32) {
    %c0_i32 = arith.constant 0 : i32
    %c0_i32_0 = arith.constant 0 : i32
    %c0_i32_1 = arith.constant 0 : i32
    return %c0_i32, %c0_i32_0 : i32, i32
  }
  func.func @transform_2(%arg0: i32) -> (i32, i32) {
    %c0_i32 = arith.constant 0 : i32
    %c0_i32_0 = arith.constant 0 : i32
    return %arg0, %c0_i32 : i32, i32
  }
}

</mosaic_0001>

<bundles_post_ra>
// kernel: tpu_custom_call.1
= control target key start
LH: loop header
LB: loop body
LE: loop exit
PB: predicated region body
PF: predicated region fallthrough
CT: control target
= control target key end

     0   :  { %7 = vsyncpa [#allocation3], 0  ;;  %s1754_s0 = inlined_call_operand.hbm [shape: f32[256,128], index: 0, kind: input, shape index: {}]   ;;  %s1755_s1 = inlined_call_operand.hbm [shape: f32[128,768], index: 1, kind: input, shape index: {}]   ;;  %s1756_s2 = inlined_call_operand.hbm [shape: f32[256,768], index: 2, kind: output, shape index: {}]  }
   0x1   :  { %9 = vsyncpa [#allocation3 + $0x1], 0 }
   0x2   :  { %10 = vsyncpa [#allocation6], 0 }
   0x3   :  { %11 = vsyncpa [#allocation4], 0 }
   0x4   :  { %13 = vsyncpa [#allocation4 + $0x1], 0  ;;  %s1317_s9 = smov 0   ;;  %s1319_s10 = smov 0  }
   0x5   :  { %s1321_s11 = smov 0   ;;  %s1323_s12 = smov 0  }
   0x6 LB: > { %s1338_s13 = sadd.s32 4294967295, %s1290_s12   ;;  %s968_s14 = sadd.s32 4294967294, %s1290_s12   ;;  %s1290_s12 = sphi %s1323_s12, %s1776_s12   ;;  %s1286_s11 = sphi %s1321_s11, %s1775_s11   ;;  %s1282_s10 = sphi %s1319_s10, %s1774_s10   ;;  %s1278_s9 = sphi %s1317_s9, %s1773_s9  }
   0x7   : > { %p39_p0 = scmp.ne.s32.totalorder %s1282_s10, %s1278_s9  ;;  %p1757_p1 = scmp.eq.s32.totalorder %s1338_s13, 0 }
   0x8   : > { %p90_p3 = scmp.eq.s32.totalorder %s968_s14, 1  ;;  %p969_p5 = scmp.ge.s32.totalorder %s1290_s12, 1 }
   0x9   : > { %p1347_p4 = por %p1757_p1, %p39_p0  ;;  %p97_p7 = scmp.lt.s32.totalorder %s1290_s12, 3 }
   0xa   : > { %p1352_p6 = por %p90_p3, %p39_p0  ;;  %s1292_s18 = smov [#allocation5]  }
   0xb   : > { %s1760_s15 = scalar_select %p1347_p4, 1, 0 }
   0xc   : > { %s1761_s16 = scalar_select %p1352_p6, 1, 0 }
   0xd   : > { %p1357_p8 = pnand %p969_p5, %p97_p7  ;;  %s109_s19 = sshll.u32 %s1292_s18, 4  ;;  %s1361_s19 = int_to_ptr.vmem [resolvable:$true] %s109_s19 }
   0xe   : > { %s1373_s21 = sadd.s32 1, %s1290_s12   ;;  %s26_s22 = sadd.s32 1, %s1286_s11 }
   0xf   : > { %s1762_s17 = scalar_select %p1357_p8, 1, 0 }
  0x10   : > { %p1106_p9 = pneg %p1357_p8  ;;  %s23_s23 = ssub.s32 %s1290_s12, %s1373_s21 }
  0x11   : > { %s1162_s26 = scalar_lea.hbm %s1755_s1, 12288 }
  0x12   : > { %p1368_p11 = pnand %p1106_p9, %p1757_p1  ;;  %p1163_p12 = scmp.ne.s32.totalorder %s1755_s1, %s1162_s26 }
  0x13   : > { %p1169_p5 = scmp.lt.u32.totalorder %s1162_s26, %s1755_s1 }
  0x14   : > { %p1164_p13 = pneg %p1368_p11 }
  0x16   : > { %p1165_p0 = pnand %p1164_p13, %p1163_p12 }
  0x18   : > { %p1166_p3 = pneg %p1165_p0 }
  0x1a   : > { %p1171_p7 = pnand %p1169_p5, %p1166_p3 }
  0x1c   : > { %1174 = shalt.err (!%p1171_p7)
}
  0x1d   : > { %s1175_s3 = scalar_lea.vmem %s1361_s19, 12288  ;;  %p1183_p2 = scmp.lt.s32.totalorder %s1361_s19, %s1361_s19 }
  0x1e   : > { %p1176_p9 = scmp.ne.s32.totalorder %s1361_s19, %s1175_s3  ;;  %p1184_p6 = scmp.lt.s32.totalorder %s1175_s3, %s1175_s3 }
  0x20   : > { %p1178_p10 = pnand %p1176_p9, %p1164_p13  ;;  %p1185_p4 = por %p1184_p6, %p1183_p2 }
  0x22   : > { %p1179_p1 = pneg %p1178_p10 }
  0x24   : > { %p1186_p8 = pnand %p1185_p4, %p1179_p1 }
  0x26   : > { %1189 = shalt.err (!%p1186_p8)
}
  0x27   : > { %s1293_s4 = smov 768   ;;  %s1294_s5 = smov 48  }
  0x28   : > { %1109 = dma.hbm_to_vmem [thread:$0]  (!%p1368_p11), %s1755_s1, 12288, %s1361_s19, [#allocation6], %s1293_s4, %s1293_s4, %s1294_s5  }
  0x29   : > { %p24_p2 = scmp.eq.s32.totalorder %s23_s23, 0  ;;  %p33_p1 = scmp.ne.s32.totalorder %s1286_s11, %s1282_s10 }
  0x2a   : > { %p34_p4 = scmp.eq.s32.totalorder %s1290_s12, 0  ;;  %p1119_p6 = scmp.lt.s32.totalorder %s1290_s12, 2 }
  0x2b   : > { %s1404_s8 = scalar_select %p24_p2, %s1286_s11, %s26_s22  }
  0x2c   : > { %p35_p8 = por %p34_p4, %p33_p1  ;;  %p1764_p10 = scmp.eq.s32.totalorder %s1338_s13, 1 }
  0x2d   : > { %s123_s18 = sand.u32 1, %s1286_s11   ;;  %s983_s24 = sshll.u32 %s1290_s12, 11 }
  0x2e   : > { %p1408_p12 = por %p1764_p10, %p33_p1  ;;  %s972_s25 = sshll.u32 %s123_s18, 7 }
  0x2f   : > { %s1417_s27 = scalar_lea.hbm %s1754_s0, %s983_s24  ;;  %s127_s19 = scalar_lea.vmem [#allocation2], %s972_s25 }
  0x30   : > { %s134_s22 = sshll.u32 %s127_s19, 4  ;;  %p1419_p11 = pnand %p1119_p6, %p35_p8  ;;  %s1423_s22 = int_to_ptr.vmem [resolvable:$true] %s134_s22 }
  0x31   : > { %s1425_s28 = scalar_lea.sflag [#allocation3], %s123_s18  ;;  %s1190_s29 = scalar_lea.hbm %s1417_s27, 2048 }
  0x32   : > { %p1191_p13 = scmp.ne.s32.totalorder %s1417_s27, %s1190_s29  ;;  %p1192_p0 = pneg %p1419_p11 }
  0x33   : > { %s1195_s4 = scalar_lea.hbm %s1754_s0, 4096  ;;  %p1196_p7 = scmp.lt.u32.totalorder %s1417_s27, %s1754_s0 }
  0x34   : > { %p1193_p3 = pnand %p1192_p0, %p1191_p13  ;;  %p1197_p9 = scmp.lt.u32.totalorder %s1195_s4, %s1190_s29 }
  0x35   : > { %p1199_p1 = scmp.lt.u32.totalorder %s1190_s29, %s1417_s27 }
  0x36   : > { %p1194_p5 = pneg %p1193_p3  ;;  %p1198_p2 = por %p1197_p9, %p1196_p7 }
  0x38   : > { %p1200_p4 = por %p1199_p1, %p1198_p2 }
  0x3a   : > { %p1201_p6 = pnand %p1200_p4, %p1194_p5 }
  0x3c   : > { %1204 = shalt.err (!%p1201_p6)
}
  0x3d   : > { %s1205_s7 = scalar_lea.vmem %s1423_s22, 2048  ;;  %s1295_s18 = smov [#allocation2]  }
  0x3e   : > { %p1206_p8 = scmp.ne.s32.totalorder %s1423_s22, %s1205_s7  ;;  %s1210_s24 = sshll.u32 %s1295_s18, 4  ;;  %s1211_s24 = int_to_ptr.vmem [resolvable:$false] %s1210_s24 }
  0x3f   : > { %s1212_s25 = scalar_lea.vmem %s1211_s24, 4096  ;;  %p1213_p3 = scmp.lt.s32.totalorder %s1423_s22, %s1211_s24 }
  0x40   : > { %p1208_p10 = pnand %p1206_p8, %p1192_p0  ;;  %p1214_p7 = scmp.lt.s32.totalorder %s1212_s25, %s1205_s7 }
  0x42   : > { %p1209_p13 = pneg %p1208_p10  ;;  %p1215_p9 = por %p1214_p7, %p1213_p3 }
  0x44   : > { %p1216_p2 = pnand %p1215_p9, %p1209_p13 }
  0x46   : > { %1219 = shalt.err (!%p1216_p2)
}
  0x47   : > { %s1296_s20 = smov 128   ;;  %s1297_s26 = smov 8  }
  0x48   : > { %1113 = dma.hbm_to_vmem [thread:$0]  (!%p1419_p11), %s1417_s27, 2048, %s1423_s22, %s1425_s28, %s1296_s20, %s1296_s20, %s1297_s26  }
  0x49   : > { %p1767_p0 = scmp.ne.s32.totalorder %s1762_s17, 0 }
  0x4a   : > { %s1456_s19 = sand.u32 (!%p1767_p0), 1, %s1282_s10   ;;  %p1768_p5 = scmp.ne.s32.totalorder (!%p1767_p0), %s1760_s15, 0 }
  0x4b   : > { %146 = sbr.rel (%p1767_p0) target bundleno = 441 (0x1b9), region = 28  ;;  %s976_s29 = sshll.u32 (!%p1767_p0), %s1456_s19, 7 }
  0x4c   : > { %s149_s30 = scalar_lea.sflag (!%p1767_p0), [#allocation3], %s1456_s19  ;;  %s1460_s3 = scalar_lea.vmem (!%p1767_p0), [#allocation2], %s976_s29 }
  0x52   : > { %1265 = dma.done.wait (%p1768_p5), %s149_s30, 2048  }
  0x53   : > { %1267 = vsyncadd (%p1768_p5), %s149_s30, 4294965248  ;;  %p1769_p11 = scmp.eq.s32.totalorder %s1338_s13, 0 }
  0x55   : > { %1269 = dma.done.wait (%p1769_p11), [#allocation6], 12288   ;;  %p1770_p1 = pmov %p1769_p11 }
  0x56   : > { %v1298_v0 = vmov 0.0   ;;  %v196_v1 = vld [vmem:[#allocation5 + $0x8] sm:$0xff]  ;;  %v202_v2 = vld [vmem:[#allocation5 + $0x38] sm:$0xff]  ;;  %v195_v3 = vld [vmem:[#allocation5] sm:$0xff]  ;;  %s1096_s15 = smul.u32 768, %s1456_s19  ;;  %s1299_s6 = smov [#allocation7]  }
  0x57   : > { %1271 = vsyncadd (%p1770_p1), [#allocation6], 4294955008  ;;  %355 = vmatprep.mubr.f32.mxu0 %v1298_v0  ;;  %403 = vmatprep.mubr.f32.mxu1 %v1298_v0  ;;  %v984_v4 = vpack.c.bf16 %v202_v2, %v196_v1  ;;  %v201_v5 = vld [vmem:[#allocation5 + $0x30] sm:$0xff]  ;;  %v208_v6 = vld [vmem:[#allocation5 + $0x68] sm:$0xff]  ;;  %s1097_s27 = smul.u32 12288, %s1338_s13  ;;  %s871_s13 = scalar_lea.sflag [#allocation4], %s1456_s19 }
  0x58   : > { %v214_v7 = vld [vmem:[#allocation5 + $0x98] sm:$0xff]  ;;  %v986_v8 = vpack.c.bf16 %v201_v5, %v195_v3  ;;  %v207_v10 = vld [vmem:[#allocation5 + $0x60] sm:$0xff]  ;;  %v213_v11 = vld [vmem:[#allocation5 + $0x90] sm:$0xff]  ;;  %s1605_s17 = scalar_lea.vmem [#allocation7], %s1096_s15  ;;  %s1224_s7 = sshll.u32 %s1299_s6, 4  ;;  %s1225_s7 = int_to_ptr.vmem [resolvable:$false] %s1224_s7 }
  0x59   : > { %v988_v9 = vpack.c.bf16 %v214_v7, %v208_v6  ;;  %v220_v12 = vld [vmem:[#allocation5 + $0xc8] sm:$0xff]  ;;  %985 = vmatprep.subr.bf16.mxu0 %v984_v4  ;;  %1080 = vmatprep.subr.bf16.mxu1 %v984_v4  ;;  %v226_v13 = vld [vmem:[#allocation5 + $0xf8] sm:$0xff]  ;;  %v990_v14 = vpack.c.bf16 %v213_v11, %v207_v10  ;;  %v219_v16 = vld [vmem:[#allocation5 + $0xc0] sm:$0xff]  ;;  %s885_s22 = sshll.u32 %s1605_s17, 4  ;;  %s1704_s4 = scalar_lea.hbm %s1756_s2, %s1097_s27  ;;  %s1706_s22 = int_to_ptr.vmem [resolvable:$true] %s885_s22 }
  0x5a   : > { %987 = vmatpush1.bf16.msra.mxu0 %v986_v8  ;;  %1088 = vmatpush1.bf16.msra.mxu1 %v986_v8  ;;  %v992_v15 = vpack.c.bf16 %v226_v13, %v220_v12  ;;  %v225_v17 = vld [vmem:[#allocation5 + $0xf0] sm:$0xff]  ;;  %v232_v18 = vld [vmem:[#allocation5 + $0x128] sm:$0xff]  ;;  %v238_v19 = vld [vmem:[#allocation5 + $0x158] sm:$0xff]  ;;  %s1220_s5 = scalar_lea.vmem %s1706_s22, 12288  ;;  %s1226_s18 = scalar_lea.vmem %s1225_s7, 24576 }
  0x5b   : > { %989 = vmatprep.subr.bf16.mxu0 %v988_v9  ;;  %1081 = vmatprep.subr.bf16.mxu1 %v988_v9  ;;  %v994_v20 = vpack.c.bf16 %v225_v17, %v219_v16  ;;  %v996_v21 = vpack.c.bf16 %v238_v19, %v232_v18  ;;  %v231_v22 = vld [vmem:[#allocation5 + $0x120] sm:$0xff]  ;;  %v237_v23 = vld [vmem:[#allocation5 + $0x150] sm:$0xff]  ;;  %v244_v24 = vld [vmem:[#allocation5 + $0x188] sm:$0xff]  ;;  %p1221_p4 = scmp.ne.s32.totalorder %s1706_s22, %s1220_s5  ;;  %p1227_p10 = scmp.lt.s32.totalorder %s1706_s22, %s1225_s7 }
  0x5c   : > { %v250_v25 = vld [vmem:[#allocation5 + $0x1b8] sm:$0xff]  ;;  %v998_v26 = vpack.c.bf16 %v237_v23, %v231_v22  ;;  %v243_v28 = vld [vmem:[#allocation5 + $0x180] sm:$0xff]  ;;  %v249_v29 = vld [vmem:[#allocation5 + $0x1b0] sm:$0xff]  ;;  %p1228_p13 = scmp.lt.s32.totalorder %s1226_s18, %s1220_s5 }
  0x5d   : > { %v1000_v27 = vpack.c.bf16 %v250_v25, %v244_v24  ;;  %v256_v30 = vld [vmem:[#allocation5 + $0x1e8] sm:$0xff]  ;;  %v262_v31 = vld [vmem:[#allocation5 + $0x218] sm:$0xff]  ;;  %v1002_v32 = vpack.c.bf16 %v249_v29, %v243_v28  ;;  %v255_v34 = vld [vmem:[#allocation5 + $0x1e0] sm:$0xff]  ;;  %p1222_p6 = pnand %p1221_p4, %p1408_p12 }
  0x5e   : > { %991 = vmatpush1.bf16.msra.mxu0 %v990_v14  ;;  %1089 = vmatpush1.bf16.msra.mxu1 %v990_v14  ;;  %v1004_v33 = vpack.c.bf16 %v262_v31, %v256_v30  ;;  %v261_v35 = vld [vmem:[#allocation5 + $0x210] sm:$0xff]  ;;  %v268_v36 = vld [vmem:[#allocation5 + $0x248] sm:$0xff]  ;;  %v274_v37 = vld [vmem:[#allocation5 + $0x278] sm:$0xff]  ;;  %p1229_p3 = por %p1228_p13, %p1227_p10 }
  0x5f   : > { %993 = vmatprep.subr.bf16.mxu0 %v992_v15  ;;  %1082 = vmatprep.subr.bf16.mxu1 %v992_v15  ;;  %v1006_v38 = vpack.c.bf16 %v261_v35, %v255_v34  ;;  %v1008_v39 = vpack.c.bf16 %v274_v37, %v268_v36  ;;  %v267_v40 = vld [vmem:[#allocation5 + $0x240] sm:$0xff]  ;;  %v273_v41 = vld [vmem:[#allocation5 + $0x270] sm:$0xff]  ;;  %v280_v42 = vld [vmem:[#allocation5 + $0x2a8] sm:$0xff]  ;;  %p1223_p8 = pneg %p1222_p6 }
  0x60   : > { %v286_v43 = vld [vmem:[#allocation5 + $0x2d8] sm:$0xff]  ;;  %v1010_v44 = vpack.c.bf16 %v273_v41, %v267_v40  ;;  %v279_v46 = vld [vmem:[#allocation5 + $0x2a0] sm:$0xff]  ;;  %v285_v47 = vld [vmem:[#allocation5 + $0x2d0] sm:$0xff] }
  0x61   : > { %v1012_v45 = vpack.c.bf16 %v286_v43, %v280_v42  ;;  %v198_v48 = vld [vmem:[#allocation5 + $0x18] sm:$0xff]  ;;  %v204_v49 = vld [vmem:[#allocation5 + $0x48] sm:$0xff]  ;;  %v1014_v52 = vpack.c.bf16 %v285_v47, %v279_v46  ;;  %v197_v53 = vld [vmem:[#allocation5 + $0x10] sm:$0xff]  ;;  %p1230_p7 = pnand %p1229_p3, %p1223_p8 }
  0x62   : > { %995 = vmatpush1.bf16.msra.mxu0 %v994_v20  ;;  %1090 = vmatpush1.bf16.msra.mxu1 %v994_v20  ;;  %v200_v50 = vld [vmem:[#allocation5 + $0x28] sm:$0xff]  ;;  %v206_v51 = vld [vmem:[#allocation5 + $0x58] sm:$0xff]  ;;  %v1016_v54 = vpack.c.bf16 %v204_v49, %v198_v48  ;;  %v203_v56 = vld [vmem:[#allocation5 + $0x40] sm:$0xff] }
  0x63   : > { %997 = vmatprep.subr.bf16.mxu0 %v996_v21  ;;  %1083 = vmatprep.subr.bf16.mxu1 %v996_v21  ;;  %v1048_v55 = vpack.c.bf16 %v206_v51, %v200_v50  ;;  %v199_v57 = vld [vmem:[#allocation5 + $0x20] sm:$0xff]  ;;  %v205_v58 = vld [vmem:[#allocation5 + $0x50] sm:$0xff]  ;;  %v210_v59 = vld [vmem:[#allocation5 + $0x78] sm:$0xff]  ;;  %v1018_v2 = vpack.c.bf16 %v203_v56, %v197_v53 }
  0x64   : > { %v216_v60 = vld [vmem:[#allocation5 + $0xa8] sm:$0xff]  ;;  %v218_v62 = vld [vmem:[#allocation5 + $0xb8] sm:$0xff]  ;;  %v1473_v63 = vld [vmem:[%s1460_s3] sm:$0xff]  ;;  %v1050_v3 = vpack.c.bf16 %v205_v58, %v199_v57 }
  0x65   : > { %v212_v61 = vld [vmem:[#allocation5 + $0x88] sm:$0xff]  ;;  %v1476_v1 = vld [vmem:[%s1460_s3 + $0x40] sm:$0xff]  ;;  %v209_v4 = vld [vmem:[#allocation5 + $0x70] sm:$0xff]  ;;  %v1020_v8 = vpack.c.bf16 %v216_v60, %v210_v59 }
  0x66   : > { %999 = vmatpush1.bf16.msra.mxu0 %v998_v26  ;;  %1091 = vmatpush1.bf16.msra.mxu1 %v998_v26  ;;  %v215_v5 = vld [vmem:[#allocation5 + $0xa0] sm:$0xff]  ;;  %v217_v7 = vld [vmem:[#allocation5 + $0xb0] sm:$0xff]  ;;  %v1052_v9 = vpack.c.bf16 %v218_v62, %v212_v61  ;;  %v222_v10 = vld [vmem:[#allocation5 + $0xd8] sm:$0xff] }
  0x67   : > { %1001 = vmatprep.subr.bf16.mxu0 %v1000_v27  ;;  %1084 = vmatprep.subr.bf16.mxu1 %v1000_v27  ;;  %v211_v6 = vld [vmem:[#allocation5 + $0x80] sm:$0xff]  ;;  %v228_v11 = vld [vmem:[#allocation5 + $0x108] sm:$0xff]  ;;  %v230_v13 = vld [vmem:[#allocation5 + $0x118] sm:$0xff]  ;;  %v1022_v16 = vpack.c.bf16 %v215_v5, %v209_v4 }
  0x68   : > { %v224_v12 = vld [vmem:[#allocation5 + $0xe8] sm:$0xff]  ;;  %v1054_v17 = vpack.c.bf16 %v217_v7, %v211_v6  ;;  %v221_v18 = vld [vmem:[#allocation5 + $0xd0] sm:$0xff]  ;;  %v227_v19 = vld [vmem:[#allocation5 + $0x100] sm:$0xff]  ;;  %v1024_v22 = vpack.c.bf16 %v228_v11, %v222_v10 }
  0x69   : > { %v1481_v14 = vld [vmem:[%s1460_s3 + $0x8] sm:$0xff]  ;;  %v223_v20 = vld [vmem:[#allocation5 + $0xe0] sm:$0xff]  ;;  %v229_v21 = vld [vmem:[#allocation5 + $0x110] sm:$0xff]  ;;  %v1056_v23 = vpack.c.bf16 %v230_v13, %v224_v12  ;;  %v1026_v30 = vpack.c.bf16 %v227_v19, %v221_v18 }
  0x6a   : > { %1003 = vmatpush1.bf16.msra.mxu0 %v1002_v32  ;;  %1092 = vmatpush1.bf16.msra.mxu1 %v1002_v32  ;;  %v1484_v15 = vld [vmem:[%s1460_s3 + $0x48] sm:$0xff]  ;;  %v234_v24 = vld [vmem:[#allocation5 + $0x138] sm:$0xff]  ;;  %v1491_v28 = vld [vmem:[%s1460_s3 + $0x10] sm:$0xff]  ;;  %v1058_v31 = vpack.c.bf16 %v229_v21, %v223_v20 }
  0x6b   : > { %1005 = vmatprep.subr.bf16.mxu0 %v1004_v33  ;;  %1085 = vmatprep.subr.bf16.mxu1 %v1004_v33  ;;  %v240_v25 = vld [vmem:[#allocation5 + $0x168] sm:$0xff]  ;;  %v242_v27 = vld [vmem:[#allocation5 + $0x178] sm:$0xff]  ;;  %v1494_v29 = vld [vmem:[%s1460_s3 + $0x50] sm:$0xff] }
  0x6c   : > { %v236_v26 = vld [vmem:[#allocation5 + $0x148] sm:$0xff]  ;;  %v233_v32 = vld [vmem:[#allocation5 + $0x130] sm:$0xff]  ;;  %v239_v33 = vld [vmem:[#allocation5 + $0x160] sm:$0xff]  ;;  %v1028_v36 = vpack.c.bf16 %v240_v25, %v234_v24 }
  0x6d   : > { %v235_v34 = vld [vmem:[#allocation5 + $0x140] sm:$0xff]  ;;  %v241_v35 = vld [vmem:[#allocation5 + $0x170] sm:$0xff]  ;;  %v1060_v37 = vpack.c.bf16 %v242_v27, %v236_v26  ;;  %v248_v40 = vld [vmem:[#allocation5 + $0x1a8] sm:$0xff] }
  0x6e   : > { %1007 = vmatpush1.bf16.msra.mxu0 %v1006_v38  ;;  %1093 = vmatpush1.bf16.msra.mxu1 %v1006_v38  ;;  %v246_v38 = vld [vmem:[#allocation5 + $0x198] sm:$0xff]  ;;  %v245_v46 = vld [vmem:[#allocation5 + $0x190] sm:$0xff]  ;;  %v251_v47 = vld [vmem:[#allocation5 + $0x1c0] sm:$0xff] }
  0x6f   : > { %1009 = vmatprep.subr.bf16.mxu0 %v1008_v39  ;;  %1086 = vmatprep.subr.bf16.mxu1 %v1008_v39  ;;  %v252_v39 = vld [vmem:[#allocation5 + $0x1c8] sm:$0xff]  ;;  %v254_v41 = vld [vmem:[#allocation5 + $0x1d8] sm:$0xff]  ;;  %v247_v48 = vld [vmem:[#allocation5 + $0x1a0] sm:$0xff]  ;;  %v1034_v58 = vpack.c.bf16 %v251_v47, %v245_v46 }
  0x70   : > { %v1501_v42 = vld [vmem:[%s1460_s3 + $0x18] sm:$0xff]  ;;  %v253_v49 = vld [vmem:[#allocation5 + $0x1d0] sm:$0xff]  ;;  %v1032_v50 = vpack.c.bf16 %v252_v39, %v246_v38  ;;  %v1064_v51 = vpack.c.bf16 %v254_v41, %v248_v40  ;;  %v264_v53 = vld [vmem:[#allocation5 + $0x228] sm:$0xff] }
  0x71   : > { %v1504_v43 = vld [vmem:[%s1460_s3 + $0x58] sm:$0xff]  ;;  %v1511_v56 = vld [vmem:[%s1460_s3 + $0x20] sm:$0xff]  ;;  %v1066_v59 = vpack.c.bf16 %v253_v49, %v247_v48  ;;  %v257_v60 = vld [vmem:[#allocation5 + $0x1f0] sm:$0xff] }
  0x72   : > { %1011 = vmatpush1.bf16.msra.mxu0 %v1010_v44  ;;  %1094 = vmatpush1.bf16.msra.mxu1 %v1010_v44  ;;  %v1030_v44 = vpack.c.bf16 %v239_v33, %v233_v32  ;;  %v1514_v57 = vld [vmem:[%s1460_s3 + $0x60] sm:$0xff]  ;;  %v270_v5 = vld [vmem:[#allocation5 + $0x258] sm:$0xff]  ;;  %v276_v6 = vld [vmem:[#allocation5 + $0x288] sm:$0xff] }
  0x73   : > { %1013 = vmatprep.subr.bf16.mxu0 %v1012_v45  ;;  %1087 = vmatprep.subr.bf16.mxu1 %v1012_v45  ;;  %v1062_v45 = vpack.c.bf16 %v241_v35, %v235_v34  ;;  %v263_v61 = vld [vmem:[#allocation5 + $0x220] sm:$0xff]  ;;  %v272_v7 = vld [vmem:[#allocation5 + $0x268] sm:$0xff]  ;;  %v269_v13 = vld [vmem:[#allocation5 + $0x250] sm:$0xff]  ;;  %v1040_v19 = vpack.c.bf16 %v276_v6, %v270_v5 }
  0x74   : > { %v259_v62 = vld [vmem:[#allocation5 + $0x200] sm:$0xff]  ;;  %v1524_v10 = vld [vmem:[%s1460_s3 + $0x68] sm:$0xff]  ;;  %v1038_v11 = vpack.c.bf16 %v263_v61, %v257_v60  ;;  %v277_v18 = vld [vmem:[#allocation5 + $0x290] sm:$0xff] }
  0x75   : > { %v282_v21 = vld [vmem:[#allocation5 + $0x2b8] sm:$0xff]  ;;  %v185_v25 = vld [vmem:[%s1460_s3 + $0x30] sm:$0xff]  ;;  %v287_v32 = vld [vmem:[#allocation5 + $0x2e0] sm:$0xff] }
  0x76   : > { %1015 = vmatpush1.bf16.msra.mxu0 %v1014_v52  ;;  %1095 = vmatpush1.bf16.msra.mxu1 %v1014_v52  ;;  %v258_v52 = vld [vmem:[#allocation5 + $0x1f8] sm:$0xff]  ;;  %v1532_v26 = vld [vmem:[%s1460_s3 + $0x70] sm:$0xff]  ;;  %v283_v33 = vld [vmem:[#allocation5 + $0x2c0] sm:$0xff] }
  0x77   : > { %1017 = vmatprep.subr.bf16.mxu1 %v1016_v54  ;;  %1049 = vmatprep.subr.bf16.mxu0 %v1048_v55  ;;  %v260_v54 = vld [vmem:[#allocation5 + $0x208] sm:$0xff]  ;;  %v266_v55 = vld [vmem:[#allocation5 + $0x238] sm:$0xff]  ;;  %v289_v34 = vld [vmem:[#allocation5 + $0x2f0] sm:$0xff] }
  0x78   : > { %v1068_v4 = vpack.c.bf16 %v266_v55, %v260_v54  ;;  %v290_v24 = vld [vmem:[#allocation5 + $0x2f8] sm:$0xff]  ;;  %v1078_v40 = vpack.c.bf16 %v289_v34, %v283_v33 }
  0x79   : > { %356 = vmatmul.mubr.f32.vlgmr.msra.gmra.mrb[0].mxu0 %v1473_v63  ;;  %404 = vmatmul.mubr.f32.vlgmr.msra.gmra.mrb[0].mxu1 %v1476_v1  ;;  %v1539_v38 = vld [vmem:[%s1460_s3 + $0x78] sm:$0xff] }
  0x7a   : > { %1019 = vmatpush1.bf16.msra.mxu1 %v1018_v2  ;;  %1051 = vmatpush1.bf16.msra.mxu0 %v1050_v3  ;;  %v265_v2 = vld [vmem:[#allocation5 + $0x230] sm:$0xff]  ;;  %v1036_v3 = vpack.c.bf16 %v264_v53, %v258_v52 }
  0x7b   : > { %361 = vmatprep.mubr.f32.mxu0 %v1298_v0  ;;  %409 = vmatprep.mubr.f32.mxu1 %v1298_v0  ;;  %v1070_v12 = vpack.c.bf16 %v265_v2, %v259_v62 }
  0x7c   : > { %1021 = vmatprep.subr.bf16.mxu1 %v1020_v8  ;;  %1053 = vmatprep.subr.bf16.mxu0 %v1052_v9  ;;  %v278_v8 = vld [vmem:[#allocation5 + $0x298] sm:$0xff]  ;;  %v1521_v9 = vld [vmem:[%s1460_s3 + $0x28] sm:$0xff] }
  0x7d   : > { %362 = vmatmul.mubr.f32.gmra.mrb[2].mxu0 %v1481_v14  ;;  %410 = vmatmul.mubr.f32.gmra.mrb[2].mxu1 %v1484_v15  ;;  %v1072_v20 = vpack.c.bf16 %v278_v8, %v272_v7 }
  0x7e   : > { %1023 = vmatpush1.bf16.msra.mxu1 %v1022_v16  ;;  %1055 = vmatpush1.bf16.msra.mxu0 %v1054_v17  ;;  %v275_v16 = vld [vmem:[#allocation5 + $0x280] sm:$0xff] }
  0x7f   : > { %367 = vmatprep.mubr.f32.mxu0 %v1298_v0  ;;  %415 = vmatprep.mubr.f32.mxu1 %v1298_v0  ;;  %v271_v17 = vld [vmem:[#allocation5 + $0x260] sm:$0xff]  ;;  %v1042_v27 = vpack.c.bf16 %v275_v16, %v269_v13 }
  0x80   : > { %1025 = vmatprep.subr.bf16.mxu1 %v1024_v22  ;;  %1057 = vmatprep.subr.bf16.mxu0 %v1056_v23  ;;  %v288_v22 = vld [vmem:[#allocation5 + $0x2e8] sm:$0xff] }
  0x81   : > { %368 = vmatmul.mubr.f32.gmra.mrb[4].mxu0 %v1491_v28  ;;  %416 = vmatmul.mubr.f32.gmra.mrb[4].mxu1 %v1494_v29  ;;  %v284_v23 = vld [vmem:[#allocation5 + $0x2c8] sm:$0xff]  ;;  %v1044_v35 = vpack.c.bf16 %v288_v22, %v282_v21 }
  0x82   : > { %1027 = vmatpush1.bf16.msra.mxu1 %v1026_v30  ;;  %1059 = vmatpush1.bf16.msra.mxu0 %v1058_v31  ;;  %v1074_v30 = vpack.c.bf16 %v277_v18, %v271_v17  ;;  %v281_v31 = vld [vmem:[#allocation5 + $0x2b0] sm:$0xff] }
  0x83   : > { %373 = vmatprep.mubr.f32.mxu0 %v1298_v0  ;;  %421 = vmatprep.mubr.f32.mxu1 %v1298_v0  ;;  %v1046_v39 = vpack.c.bf16 %v287_v32, %v281_v31 }
  0x84   : > { %1029 = vmatprep.subr.bf16.mxu1 %v1028_v36  ;;  %1061 = vmatprep.subr.bf16.mxu0 %v1060_v37  ;;  %v1076_v36 = vpack.c.bf16 %v290_v24, %v284_v23  ;;  %v186_v37 = vld [vmem:[%s1460_s3 + $0x38] sm:$0xff] }
  0x85   : > { %374 = vmatmul.mubr.f32.gmra.mrb[6].mxu0 %v1501_v42  ;;  %422 = vmatmul.mubr.f32.gmra.mrb[6].mxu1 %v1504_v43 }
  0x86   : > { %1031 = vmatpush1.bf16.msra.mxu1 %v1030_v44  ;;  %1063 = vmatpush1.bf16.msra.mxu0 %v1062_v45 }
  0x87   : > { %379 = vmatprep.mubr.f32.mxu0 %v1298_v0  ;;  %427 = vmatprep.mubr.f32.mxu1 %v1298_v0 }
  0x88   : > { %1033 = vmatprep.subr.bf16.mxu1 %v1032_v50  ;;  %1065 = vmatprep.subr.bf16.mxu0 %v1064_v51 }
  0x89   : > { %380 = vmatmul.mubr.f32.gmra.mrb[8].mxu0 %v1511_v56  ;;  %428 = vmatmul.mubr.f32.gmra.mrb[8].mxu1 %v1514_v57 }
  0x8a   : > { %1035 = vmatpush1.bf16.msra.mxu1 %v1034_v58  ;;  %1067 = vmatpush1.bf16.msra.mxu0 %v1066_v59 }
  0x8b   : > { %385 = vmatprep.mubr.f32.mxu0 %v1298_v0  ;;  %433 = vmatprep.mubr.f32.mxu1 %v1298_v0 }
  0x8c   : > { %1037 = vmatprep.subr.bf16.mxu1 %v1036_v3  ;;  %1069 = vmatprep.subr.bf16.mxu0 %v1068_v4 }
  0x8d   : > { %386 = vmatmul.mubr.f32.gmra.mrb[10].mxu0 %v1521_v9  ;;  %434 = vmatmul.mubr.f32.gmra.mrb[10].mxu1 %v1524_v10 }
  0x8e   : > { %1039 = vmatpush1.bf16.msra.mxu1 %v1038_v11  ;;  %1071 = vmatpush1.bf16.msra.mxu0 %v1070_v12 }
  0x8f   : > { %391 = vmatprep.mubr.f32.mxu0 %v1298_v0  ;;  %439 = vmatprep.mubr.f32.mxu1 %v1298_v0 }
  0x90   : > { %1041 = vmatprep.subr.bf16.mxu1 %v1040_v19  ;;  %1073 = vmatprep.subr.bf16.mxu0 %v1072_v20 }
  0x91   : > { %392 = vmatmul.mubr.f32.gmra.mrb[12].mxu0 %v185_v25  ;;  %440 = vmatmul.mubr.f32.gmra.mrb[12].mxu1 %v1532_v26 }
  0x92   : > { %1043 = vmatpush1.bf16.msra.mxu1 %v1042_v27  ;;  %1075 = vmatpush1.bf16.msra.mxu0 %v1074_v30 }
  0x93   : > { %397 = vmatprep.mubr.f32.mxu0 %v1298_v0  ;;  %445 = vmatprep.mubr.f32.mxu1 %v1298_v0 }
  0x94   : > { %1045 = vmatprep.subr.bf16.mxu1 %v1044_v35  ;;  %1077 = vmatprep.subr.bf16.mxu0 %v1076_v36 }
  0x95   : > { %398 = vmatmul.mubr.f32.gmra.mrb[14].mxu0 %v186_v37  ;;  %446 = vmatmul.mubr.f32.gmra.mrb[14].mxu1 %v1539_v38 }
  0x96   : > { %1047 = vmatpush1.bf16.msra.mxu1 %v1046_v39  ;;  %1079 = vmatpush1.bf16.msra.mxu0 %v1078_v40 }
  0x97   : > { %516 = vmatprep.mubr.f32.mxu1 %v1298_v0  ;;  %677 = vmatprep.mubr.f32.mxu0 %v1298_v0 }
  0x99   : > { %517 = vmatmul.mubr.f32.vlgmr.msra.gmra.mrb[16].mxu1 %v1473_v63  ;;  %678 = vmatmul.mubr.f32.vlgmr.msra.gmra.mrb[16].mxu0 %v1473_v63 }
  0x9a   : > { %522 = vmatprep.mubr.f32.mxu1 %v1298_v0  ;;  %683 = vmatprep.mubr.f32.mxu0 %v1298_v0 }
  0x9d   : > { %523 = vmatmul.mubr.f32.gmra.mrb[18].mxu1 %v1481_v14  ;;  %684 = vmatmul.mubr.f32.gmra.mrb[18].mxu0 %v1481_v14 }
  0x9e   : > { %528 = vmatprep.mubr.f32.mxu1 %v1298_v0  ;;  %689 = vmatprep.mubr.f32.mxu0 %v1298_v0 }
  0xa1   : > { %529 = vmatmul.mubr.f32.gmra.mrb[20].mxu1 %v1491_v28  ;;  %690 = vmatmul.mubr.f32.gmra.mrb[20].mxu0 %v1491_v28 }
  0xa2   : > { %534 = vmatprep.mubr.f32.mxu1 %v1298_v0  ;;  %695 = vmatprep.mubr.f32.mxu0 %v1298_v0 }
  0xa5   : > { %535 = vmatmul.mubr.f32.gmra.mrb[22].mxu1 %v1501_v42  ;;  %696 = vmatmul.mubr.f32.gmra.mrb[22].mxu0 %v1501_v42 }
  0xa6   : > { %540 = vmatprep.mubr.f32.mxu1 %v1298_v0  ;;  %701 = vmatprep.mubr.f32.mxu0 %v1298_v0 }
  0xa9   : > { %541 = vmatmul.mubr.f32.gmra.mrb[24].mxu1 %v1511_v56  ;;  %702 = vmatmul.mubr.f32.gmra.mrb[24].mxu0 %v1511_v56 }
  0xaa   : > { %546 = vmatprep.mubr.f32.mxu1 %v1298_v0  ;;  %707 = vmatprep.mubr.f32.mxu0 %v1298_v0 }
  0xad   : > { %547 = vmatmul.mubr.f32.gmra.mrb[26].mxu1 %v1521_v9  ;;  %708 = vmatmul.mubr.f32.gmra.mrb[26].mxu0 %v1521_v9 }
  0xae   : > { %552 = vmatprep.mubr.f32.mxu1 %v1298_v0  ;;  %713 = vmatprep.mubr.f32.mxu0 %v1298_v0 }
  0xb1   : > { %553 = vmatmul.mubr.f32.gmra.mrb[28].mxu1 %v185_v25  ;;  %714 = vmatmul.mubr.f32.gmra.mrb[28].mxu0 %v185_v25 }
  0xb2   : > { %558 = vmatprep.mubr.f32.mxu1 %v1298_v0  ;;  %719 = vmatprep.mubr.f32.mxu0 %v1298_v0 }
  0xb5   : > { %559 = vmatmul.mubr.f32.gmra.mrb[30].mxu1 %v186_v37  ;;  %720 = vmatmul.mubr.f32.gmra.mrb[30].mxu0 %v186_v37 }
  0xb6   : > { %564 = vmatprep.mubr.f32.mxu1 %v1298_v0  ;;  %725 = vmatprep.mubr.f32.mxu0 %v1298_v0 }
  0xb9   : > { %565 = vmatmul.mubr.f32.gmra.mrb[32].mxu1 %v1476_v1  ;;  %726 = vmatmul.mubr.f32.gmra.mrb[32].mxu0 %v1476_v1 }
  0xba   : > { %570 = vmatprep.mubr.f32.mxu1 %v1298_v0  ;;  %731 = vmatprep.mubr.f32.mxu0 %v1298_v0 }
  0xbd   : > { %571 = vmatmul.mubr.f32.gmra.mrb[34].mxu1 %v1484_v15  ;;  %732 = vmatmul.mubr.f32.gmra.mrb[34].mxu0 %v1484_v15 }
  0xbe   : > { %576 = vmatprep.mubr.f32.mxu1 %v1298_v0  ;;  %737 = vmatprep.mubr.f32.mxu0 %v1298_v0 }
  0xc1   : > { %577 = vmatmul.mubr.f32.gmra.mrb[36].mxu1 %v1494_v29  ;;  %738 = vmatmul.mubr.f32.gmra.mrb[36].mxu0 %v1494_v29 }
  0xc2   : > { %582 = vmatprep.mubr.f32.mxu1 %v1298_v0  ;;  %743 = vmatprep.mubr.f32.mxu0 %v1298_v0 }
  0xc5   : > { %583 = vmatmul.mubr.f32.gmra.mrb[38].mxu1 %v1504_v43  ;;  %744 = vmatmul.mubr.f32.gmra.mrb[38].mxu0 %v1504_v43 }
  0xc6   : > { %588 = vmatprep.mubr.f32.mxu1 %v1298_v0  ;;  %749 = vmatprep.mubr.f32.mxu0 %v1298_v0 }
  0xc9   : > { %589 = vmatmul.mubr.f32.gmra.mrb[40].mxu1 %v1514_v57  ;;  %750 = vmatmul.mubr.f32.gmra.mrb[40].mxu0 %v1514_v57 }
  0xca   : > { %594 = vmatprep.mubr.f32.mxu1 %v1298_v0  ;;  %755 = vmatprep.mubr.f32.mxu0 %v1298_v0 }
  0xcd   : > { %595 = vmatmul.mubr.f32.gmra.mrb[42].mxu1 %v1524_v10  ;;  %756 = vmatmul.mubr.f32.gmra.mrb[42].mxu0 %v1524_v10 }
  0xce   : > { %600 = vmatprep.mubr.f32.mxu1 %v1298_v0  ;;  %761 = vmatprep.mubr.f32.mxu0 %v1298_v0 }
  0xd1   : > { %601 = vmatmul.mubr.f32.gmra.mrb[44].mxu1 %v1532_v26  ;;  %762 = vmatmul.mubr.f32.gmra.mrb[44].mxu0 %v1532_v26 }
  0xd2   : > { %606 = vmatprep.mubr.f32.mxu1 %v1298_v0  ;;  %767 = vmatprep.mubr.f32.mxu0 %v1298_v0 }
  0xd5   : > { %607 = vmatmul.mubr.f32.gmra.mrb[46].mxu1 %v1539_v38  ;;  %768 = vmatmul.mubr.f32.gmra.mrb[46].mxu0 %v1539_v38 }
 0x14c   : > { %v357_v63 = vpop.f32.mrb[0].mxu0  ;;  %v405_v1 = vpop.f32.mrb[0].mxu1 }
 0x14d   : > { %774 = vst [vmem:[%s1605_s17] sm:$0xff] %v357_v63  ;;  %822 = vst [vmem:[%s1605_s17 + $0x180] sm:$0xff] %v405_v1  ;;  %v359_v0 = vpop.f32.mrb[1].mxu0  ;;  %v407_v14 = vpop.f32.mrb[1].mxu1 }
 0x14e   : > { %775 = vst [vmem:[%s1605_s17 + $0x8] sm:$0xff] %v359_v0  ;;  %823 = vst [vmem:[%s1605_s17 + $0x188] sm:$0xff] %v407_v14 }
 0x150   : > { %v363_v15 = vpop.f32.mrb[2].mxu0  ;;  %v411_v28 = vpop.f32.mrb[2].mxu1 }
 0x151   : > { %780 = vst [vmem:[%s1605_s17 + $0x30] sm:$0xff] %v363_v15  ;;  %828 = vst [vmem:[%s1605_s17 + $0x1b0] sm:$0xff] %v411_v28  ;;  %v365_v29 = vpop.f32.mrb[3].mxu0  ;;  %v413_v41 = vpop.f32.mrb[3].mxu1 }
 0x152   : > { %781 = vst [vmem:[%s1605_s17 + $0x38] sm:$0xff] %v365_v29  ;;  %829 = vst [vmem:[%s1605_s17 + $0x1b8] sm:$0xff] %v413_v41 }
 0x154   : > { %v369_v42 = vpop.f32.mrb[4].mxu0  ;;  %v417_v43 = vpop.f32.mrb[4].mxu1 }
 0x155   : > { %786 = vst [vmem:[%s1605_s17 + $0x60] sm:$0xff] %v369_v42  ;;  %834 = vst [vmem:[%s1605_s17 + $0x1e0] sm:$0xff] %v417_v43  ;;  %v371_v44 = vpop.f32.mrb[5].mxu0  ;;  %v419_v45 = vpop.f32.mrb[5].mxu1 }
 0x156   : > { %787 = vst [vmem:[%s1605_s17 + $0x68] sm:$0xff] %v371_v44  ;;  %835 = vst [vmem:[%s1605_s17 + $0x1e8] sm:$0xff] %v419_v45 }
 0x158   : > { %v375_v46 = vpop.f32.mrb[6].mxu0  ;;  %v423_v47 = vpop.f32.mrb[6].mxu1 }
 0x159   : > { %792 = vst [vmem:[%s1605_s17 + $0x90] sm:$0xff] %v375_v46  ;;  %840 = vst [vmem:[%s1605_s17 + $0x210] sm:$0xff] %v423_v47  ;;  %v377_v48 = vpop.f32.mrb[7].mxu0  ;;  %v425_v49 = vpop.f32.mrb[7].mxu1 }
 0x15a   : > { %793 = vst [vmem:[%s1605_s17 + $0x98] sm:$0xff] %v377_v48  ;;  %841 = vst [vmem:[%s1605_s17 + $0x218] sm:$0xff] %v425_v49 }
 0x15c   : > { %v381_v50 = vpop.f32.mrb[8].mxu0  ;;  %v429_v51 = vpop.f32.mrb[8].mxu1 }
 0x15d   : > { %798 = vst [vmem:[%s1605_s17 + $0xc0] sm:$0xff] %v381_v50  ;;  %846 = vst [vmem:[%s1605_s17 + $0x240] sm:$0xff] %v429_v51  ;;  %v383_v52 = vpop.f32.mrb[9].mxu0  ;;  %v431_v53 = vpop.f32.mrb[9].mxu1 }
 0x15e   : > { %799 = vst [vmem:[%s1605_s17 + $0xc8] sm:$0xff] %v383_v52  ;;  %847 = vst [vmem:[%s1605_s17 + $0x248] sm:$0xff] %v431_v53 }
 0x160   : > { %v387_v54 = vpop.f32.mrb[10].mxu0  ;;  %v435_v55 = vpop.f32.mrb[10].mxu1 }
 0x161   : > { %804 = vst [vmem:[%s1605_s17 + $0xf0] sm:$0xff] %v387_v54  ;;  %852 = vst [vmem:[%s1605_s17 + $0x270] sm:$0xff] %v435_v55  ;;  %v389_v56 = vpop.f32.mrb[11].mxu0  ;;  %v437_v57 = vpop.f32.mrb[11].mxu1 }
 0x162   : > { %805 = vst [vmem:[%s1605_s17 + $0xf8] sm:$0xff] %v389_v56  ;;  %853 = vst [vmem:[%s1605_s17 + $0x278] sm:$0xff] %v437_v57 }
 0x164   : > { %v393_v58 = vpop.f32.mrb[12].mxu0  ;;  %v441_v59 = vpop.f32.mrb[12].mxu1 }
 0x165   : > { %810 = vst [vmem:[%s1605_s17 + $0x120] sm:$0xff] %v393_v58  ;;  %858 = vst [vmem:[%s1605_s17 + $0x2a0] sm:$0xff] %v441_v59  ;;  %v395_v60 = vpop.f32.mrb[13].mxu0  ;;  %v443_v61 = vpop.f32.mrb[13].mxu1 }
 0x166   : > { %811 = vst [vmem:[%s1605_s17 + $0x128] sm:$0xff] %v395_v60  ;;  %859 = vst [vmem:[%s1605_s17 + $0x2a8] sm:$0xff] %v443_v61 }
 0x168   : > { %v399_v62 = vpop.f32.mrb[14].mxu0  ;;  %v447_v2 = vpop.f32.mrb[14].mxu1 }
 0x169   : > { %816 = vst [vmem:[%s1605_s17 + $0x150] sm:$0xff] %v399_v62  ;;  %864 = vst [vmem:[%s1605_s17 + $0x2d0] sm:$0xff] %v447_v2  ;;  %v401_v3 = vpop.f32.mrb[15].mxu0  ;;  %v449_v4 = vpop.f32.mrb[15].mxu1 }
 0x16a   : > { %817 = vst [vmem:[%s1605_s17 + $0x158] sm:$0xff] %v401_v3  ;;  %865 = vst [vmem:[%s1605_s17 + $0x2d8] sm:$0xff] %v449_v4 }
 0x16c   : > { %v518_v5 = vpop.f32.mrb[16].mxu1  ;;  %v679_v6 = vpop.f32.mrb[16].mxu0 }
 0x16d   : > { %776 = vst [vmem:[%s1605_s17 + $0x10] sm:$0xff] %v518_v5  ;;  %778 = vst [vmem:[%s1605_s17 + $0x20] sm:$0xff] %v679_v6  ;;  %v520_v7 = vpop.f32.mrb[17].mxu1  ;;  %v681_v8 = vpop.f32.mrb[17].mxu0 }
 0x16e   : > { %777 = vst [vmem:[%s1605_s17 + $0x18] sm:$0xff] %v520_v7  ;;  %779 = vst [vmem:[%s1605_s17 + $0x28] sm:$0xff] %v681_v8 }
 0x170   : > { %v524_v9 = vpop.f32.mrb[18].mxu1  ;;  %v685_v10 = vpop.f32.mrb[18].mxu0 }
 0x171   : > { %782 = vst [vmem:[%s1605_s17 + $0x40] sm:$0xff] %v524_v9  ;;  %784 = vst [vmem:[%s1605_s17 + $0x50] sm:$0xff] %v685_v10  ;;  %v526_v11 = vpop.f32.mrb[19].mxu1  ;;  %v687_v12 = vpop.f32.mrb[19].mxu0 }
 0x172   : > { %783 = vst [vmem:[%s1605_s17 + $0x48] sm:$0xff] %v526_v11  ;;  %785 = vst [vmem:[%s1605_s17 + $0x58] sm:$0xff] %v687_v12 }
 0x174   : > { %v530_v13 = vpop.f32.mrb[20].mxu1  ;;  %v691_v16 = vpop.f32.mrb[20].mxu0 }
 0x175   : > { %788 = vst [vmem:[%s1605_s17 + $0x70] sm:$0xff] %v530_v13  ;;  %790 = vst [vmem:[%s1605_s17 + $0x80] sm:$0xff] %v691_v16  ;;  %v532_v17 = vpop.f32.mrb[21].mxu1  ;;  %v693_v18 = vpop.f32.mrb[21].mxu0 }
 0x176   : > { %789 = vst [vmem:[%s1605_s17 + $0x78] sm:$0xff] %v532_v17  ;;  %791 = vst [vmem:[%s1605_s17 + $0x88] sm:$0xff] %v693_v18 }
 0x178   : > { %v536_v19 = vpop.f32.mrb[22].mxu1  ;;  %v697_v20 = vpop.f32.mrb[22].mxu0 }
 0x179   : > { %794 = vst [vmem:[%s1605_s17 + $0xa0] sm:$0xff] %v536_v19  ;;  %796 = vst [vmem:[%s1605_s17 + $0xb0] sm:$0xff] %v697_v20  ;;  %v538_v21 = vpop.f32.mrb[23].mxu1  ;;  %v699_v22 = vpop.f32.mrb[23].mxu0 }
 0x17a   : > { %795 = vst [vmem:[%s1605_s17 + $0xa8] sm:$0xff] %v538_v21  ;;  %797 = vst [vmem:[%s1605_s17 + $0xb8] sm:$0xff] %v699_v22 }
 0x17c   : > { %v542_v23 = vpop.f32.mrb[24].mxu1  ;;  %v703_v24 = vpop.f32.mrb[24].mxu0 }
 0x17d   : > { %800 = vst [vmem:[%s1605_s17 + $0xd0] sm:$0xff] %v542_v23  ;;  %802 = vst [vmem:[%s1605_s17 + $0xe0] sm:$0xff] %v703_v24  ;;  %v544_v25 = vpop.f32.mrb[25].mxu1  ;;  %v705_v26 = vpop.f32.mrb[25].mxu0 }
 0x17e   : > { %801 = vst [vmem:[%s1605_s17 + $0xd8] sm:$0xff] %v544_v25  ;;  %803 = vst [vmem:[%s1605_s17 + $0xe8] sm:$0xff] %v705_v26 }
 0x180   : > { %v548_v27 = vpop.f32.mrb[26].mxu1  ;;  %v709_v30 = vpop.f32.mrb[26].mxu0 }
 0x181   : > { %806 = vst [vmem:[%s1605_s17 + $0x100] sm:$0xff] %v548_v27  ;;  %808 = vst [vmem:[%s1605_s17 + $0x110] sm:$0xff] %v709_v30  ;;  %v550_v31 = vpop.f32.mrb[27].mxu1  ;;  %v711_v32 = vpop.f32.mrb[27].mxu0 }
 0x182   : > { %807 = vst [vmem:[%s1605_s17 + $0x108] sm:$0xff] %v550_v31  ;;  %809 = vst [vmem:[%s1605_s17 + $0x118] sm:$0xff] %v711_v32 }
 0x184   : > { %v554_v33 = vpop.f32.mrb[28].mxu1  ;;  %v715_v34 = vpop.f32.mrb[28].mxu0 }
 0x185   : > { %812 = vst [vmem:[%s1605_s17 + $0x130] sm:$0xff] %v554_v33  ;;  %814 = vst [vmem:[%s1605_s17 + $0x140] sm:$0xff] %v715_v34  ;;  %v556_v35 = vpop.f32.mrb[29].mxu1  ;;  %v717_v36 = vpop.f32.mrb[29].mxu0 }
 0x186   : > { %813 = vst [vmem:[%s1605_s17 + $0x138] sm:$0xff] %v556_v35  ;;  %815 = vst [vmem:[%s1605_s17 + $0x148] sm:$0xff] %v717_v36 }
 0x188   : > { %v560_v37 = vpop.f32.mrb[30].mxu1  ;;  %v721_v38 = vpop.f32.mrb[30].mxu0 }
 0x189   : > { %818 = vst [vmem:[%s1605_s17 + $0x160] sm:$0xff] %v560_v37  ;;  %820 = vst [vmem:[%s1605_s17 + $0x170] sm:$0xff] %v721_v38  ;;  %v562_v39 = vpop.f32.mrb[31].mxu1  ;;  %v723_v40 = vpop.f32.mrb[31].mxu0 }
 0x18a   : > { %819 = vst [vmem:[%s1605_s17 + $0x168] sm:$0xff] %v562_v39  ;;  %821 = vst [vmem:[%s1605_s17 + $0x178] sm:$0xff] %v723_v40 }
 0x18c   : > { %v566_v63 = vpop.f32.mrb[32].mxu1  ;;  %v727_v1 = vpop.f32.mrb[32].mxu0 }
 0x18d   : > { %824 = vst [vmem:[%s1605_s17 + $0x190] sm:$0xff] %v566_v63  ;;  %826 = vst [vmem:[%s1605_s17 + $0x1a0] sm:$0xff] %v727_v1  ;;  %v568_v0 = vpop.f32.mrb[33].mxu1  ;;  %v729_v14 = vpop.f32.mrb[33].mxu0 }
 0x18e   : > { %825 = vst [vmem:[%s1605_s17 + $0x198] sm:$0xff] %v568_v0  ;;  %827 = vst [vmem:[%s1605_s17 + $0x1a8] sm:$0xff] %v729_v14 }
 0x190   : > { %v572_v15 = vpop.f32.mrb[34].mxu1  ;;  %v733_v28 = vpop.f32.mrb[34].mxu0 }
 0x191   : > { %830 = vst [vmem:[%s1605_s17 + $0x1c0] sm:$0xff] %v572_v15  ;;  %832 = vst [vmem:[%s1605_s17 + $0x1d0] sm:$0xff] %v733_v28  ;;  %v574_v29 = vpop.f32.mrb[35].mxu1  ;;  %v735_v41 = vpop.f32.mrb[35].mxu0 }
 0x192   : > { %831 = vst [vmem:[%s1605_s17 + $0x1c8] sm:$0xff] %v574_v29  ;;  %833 = vst [vmem:[%s1605_s17 + $0x1d8] sm:$0xff] %v735_v41 }
 0x194   : > { %v578_v42 = vpop.f32.mrb[36].mxu1  ;;  %v739_v43 = vpop.f32.mrb[36].mxu0 }
 0x195   : > { %836 = vst [vmem:[%s1605_s17 + $0x1f0] sm:$0xff] %v578_v42  ;;  %838 = vst [vmem:[%s1605_s17 + $0x200] sm:$0xff] %v739_v43  ;;  %v580_v44 = vpop.f32.mrb[37].mxu1  ;;  %v741_v45 = vpop.f32.mrb[37].mxu0 }
 0x196   : > { %837 = vst [vmem:[%s1605_s17 + $0x1f8] sm:$0xff] %v580_v44  ;;  %839 = vst [vmem:[%s1605_s17 + $0x208] sm:$0xff] %v741_v45 }
 0x198   : > { %v584_v46 = vpop.f32.mrb[38].mxu1  ;;  %v745_v47 = vpop.f32.mrb[38].mxu0 }
 0x199   : > { %842 = vst [vmem:[%s1605_s17 + $0x220] sm:$0xff] %v584_v46  ;;  %844 = vst [vmem:[%s1605_s17 + $0x230] sm:$0xff] %v745_v47  ;;  %v586_v48 = vpop.f32.mrb[39].mxu1  ;;  %v747_v49 = vpop.f32.mrb[39].mxu0 }
 0x19a   : > { %843 = vst [vmem:[%s1605_s17 + $0x228] sm:$0xff] %v586_v48  ;;  %845 = vst [vmem:[%s1605_s17 + $0x238] sm:$0xff] %v747_v49 }
 0x19c   : > { %v590_v50 = vpop.f32.mrb[40].mxu1  ;;  %v751_v51 = vpop.f32.mrb[40].mxu0 }
 0x19d   : > { %848 = vst [vmem:[%s1605_s17 + $0x250] sm:$0xff] %v590_v50  ;;  %850 = vst [vmem:[%s1605_s17 + $0x260] sm:$0xff] %v751_v51  ;;  %v592_v52 = vpop.f32.mrb[41].mxu1  ;;  %v753_v53 = vpop.f32.mrb[41].mxu0 }
 0x19e   : > { %849 = vst [vmem:[%s1605_s17 + $0x258] sm:$0xff] %v592_v52  ;;  %851 = vst [vmem:[%s1605_s17 + $0x268] sm:$0xff] %v753_v53 }
 0x1a0   : > { %v596_v54 = vpop.f32.mrb[42].mxu1  ;;  %v757_v55 = vpop.f32.mrb[42].mxu0 }
 0x1a1   : > { %854 = vst [vmem:[%s1605_s17 + $0x280] sm:$0xff] %v596_v54  ;;  %856 = vst [vmem:[%s1605_s17 + $0x290] sm:$0xff] %v757_v55  ;;  %v598_v56 = vpop.f32.mrb[43].mxu1  ;;  %v759_v57 = vpop.f32.mrb[43].mxu0 }
 0x1a2   : > { %855 = vst [vmem:[%s1605_s17 + $0x288] sm:$0xff] %v598_v56  ;;  %857 = vst [vmem:[%s1605_s17 + $0x298] sm:$0xff] %v759_v57 }
 0x1a4   : > { %v602_v58 = vpop.f32.mrb[44].mxu1  ;;  %v763_v59 = vpop.f32.mrb[44].mxu0 }
 0x1a5   : > { %860 = vst [vmem:[%s1605_s17 + $0x2b0] sm:$0xff] %v602_v58  ;;  %862 = vst [vmem:[%s1605_s17 + $0x2c0] sm:$0xff] %v763_v59  ;;  %v604_v60 = vpop.f32.mrb[45].mxu1  ;;  %v765_v61 = vpop.f32.mrb[45].mxu0 }
 0x1a6   : > { %861 = vst [vmem:[%s1605_s17 + $0x2b8] sm:$0xff] %v604_v60  ;;  %863 = vst [vmem:[%s1605_s17 + $0x2c8] sm:$0xff] %v765_v61 }
 0x1a8   : > { %v608_v62 = vpop.f32.mrb[46].mxu1  ;;  %v769_v2 = vpop.f32.mrb[46].mxu0 }
 0x1a9   : > { %866 = vst [vmem:[%s1605_s17 + $0x2e0] sm:$0xff] %v608_v62  ;;  %868 = vst [vmem:[%s1605_s17 + $0x2f0] sm:$0xff] %v769_v2  ;;  %v610_v3 = vpop.f32.mrb[47].mxu1  ;;  %v771_v4 = vpop.f32.mrb[47].mxu0 }
 0x1aa   : > { %867 = vst [vmem:[%s1605_s17 + $0x2e8] sm:$0xff] %v610_v3  ;;  %869 = vst [vmem:[%s1605_s17 + $0x2f8] sm:$0xff] %v771_v4 }
 0x1ab   : > { %1233 = shalt.err (!%p1230_p7)
}
 0x1ac   : > { %s1234_s24 = scalar_lea.hbm %s1704_s4, 12288  ;;  %s1238_s26 = scalar_lea.hbm %s1756_s2, 24576 }
 0x1ad   : > { %p1235_p9 = scmp.ne.s32.totalorder %s1704_s4, %s1234_s24  ;;  %p1239_p5 = scmp.lt.u32.totalorder %s1704_s4, %s1756_s2 }
 0x1ae   : > { %p1240_p11 = scmp.lt.u32.totalorder %s1238_s26, %s1234_s24  ;;  %p1242_p4 = scmp.lt.u32.totalorder %s1234_s24, %s1704_s4 }
 0x1af   : > { %p1236_p2 = pnand %p1235_p9, %p1408_p12 }
 0x1b0   : > { %p1241_p1 = por %p1240_p11, %p1239_p5 }
 0x1b1   : > { %p1237_p0 = pneg %p1236_p2 }
 0x1b2   : > { %p1243_p6 = por %p1242_p4, %p1241_p1 }
 0x1b4   : > { %p1244_p8 = pnand %p1243_p6, %p1237_p0 }
 0x1b6   : > { %1247 = shalt.err (!%p1244_p8)
}
 0x1b7   : > { %s1300_s3 = smov 768   ;;  %s1301_s15 = smov 48  }
 0x1b8   : > { %1104 = dma.vmem_to_hbm [thread:$0]  (%p1408_p12), %s1706_s22, 12288, %s1704_s4, %s871_s13, %s1300_s3, %s1300_s3, %s1301_s15  }
 0x1b9 PF: > { %s900_s17 = sand.u32 1, %s1278_s9   ;;  %p1771_p10 = scmp.ne.s32.totalorder %s1761_s16, 0 }
 0x1ba   : > { %p1772_p13 = scmp.ge.s32.totalorder %s1290_s12, 2  ;;  %s901_s27 = scalar_lea.sflag [#allocation4], %s900_s17 }
 0x1bc   : > { %p1115_p3 = pnand %p1772_p13, %p1771_p10 }
 0x1be   : > { %1273 = dma.done.wait (!%p1115_p3), %s901_s27, 12288  }
 0x1bf   : > { %1275 = vsyncadd (!%p1115_p3), %s901_s27, 4294955008  ;;  %p16_p7 = scmp.ge.s32.totalorder %s1373_s21, 4   ;;  %s1773_s9 = smov %s1282_s10 }
 0x1c0   : > { %s1774_s10 = smov %s1286_s11  ;;  %s1775_s11 = smov %s1404_s8 }
 0x1c1   : > { %s1776_s12 = smov %s1373_s21  ;;  %18 = sbr.rel (!%p16_p7) target bundleno = 6 (0x6), region = 77 }
 0x1c8   :  { %906 = vsyncpa [#allocation3], 1 }
 0x1c9   :  { %908 = vsyncpa [#allocation3 + $0x1], 1 }
 0x1ca   :  { %909 = vsyncpa [#allocation6], 1 }
 0x1cb   :  { %910 = vsyncpa [#allocation4], 1 }
 0x1cc   :  { %912 = vsyncpa [#allocation4 + $0x1], 1 }

</bundles_post_ra>
